<compile_context>
chip_gen: v7x
topology: tpu7x:2x2x1
jax: 0.10.0
libtpu: 0.0.40
codegen_flags: <defaults>
</compile_context>

<pallas_src>
import functools

import jax
import jax.numpy as jnp
from jax.experimental import pallas as pl
from jax.experimental.pallas import tpu as pltpu


def _round_up(x: int, m: int) -> int:
    return (x + m - 1) // m * m


def _vmem_budget_bytes(default: int = 48 * 1024 * 1024) -> int:
    """Generation-aware scoped-VMEM limit: physical minus headroom, capped."""
    try:
        cap = pltpu.get_tpu_info().vmem_capacity_bytes
        return int(min(max(cap - (16 << 20), 32 << 20), 96 << 20))
    except Exception:   # pragma: no cover - conservative fallback
        return default


# --------------------------------------------------------------------------
# Kernel 1: adaLN modulation = Linear(SiLU(vec))  ->  [batch, 2*hidden]
# --------------------------------------------------------------------------
def _adaln_kernel(vec_ref, w_ref, b_ref, o_ref):
    # vec_ref: (B, H) resident; w_ref: (H, tn) tile; b_ref: (1, tn); o_ref: (B, tn)
    v = vec_ref[...].astype(jnp.float32)
    v = v * jax.nn.sigmoid(v)                               # SiLU (sigmoid -> EUP)
    y = jnp.dot(v.astype(w_ref.dtype), w_ref[...],          # native-dtype MXU path
                preferred_element_type=jnp.float32)
    o_ref[...] = (y + b_ref[...].astype(jnp.float32)).astype(o_ref.dtype)


def adaln_modulation(vec: jax.Array, w_mod: jax.Array, b_mod: jax.Array) -> jax.Array:
    """mod = SiLU(vec) @ w_mod + b_mod.  vec: [B, H], w_mod: [H, 2H], b_mod: [2H]."""
    batch, hidden = vec.shape
    out2 = w_mod.shape[1]
    b2 = b_mod.reshape(1, out2)

    # Tile the [H, 2H] weight along the output dim: at Flux H=3072 the full f32
    # weight is 72 MiB (> v7x 64 MiB VMEM).  Weight-bandwidth bound -> the DMA
    # of the next tile pipelines against the tiny matmul.
    tn = out2 if out2 <= 1024 else 1024                     # 1024 is a multiple of 128
    grid = (pl.cdiv(out2, tn),)

    return pl.pallas_call(
        _adaln_kernel,
        out_shape=jax.ShapeDtypeStruct((batch, out2), vec.dtype),
        grid_spec=pltpu.PrefetchScalarGridSpec(
            num_scalar_prefetch=0,
            grid=grid,
            in_specs=[
                pl.BlockSpec((batch, hidden), lambda j: (0, 0)),   # vec resident
                pl.BlockSpec((hidden, tn), lambda j: (0, j)),      # weight tile
                pl.BlockSpec((1, tn), lambda j: (0, j)),
            ],
            out_specs=pl.BlockSpec((batch, tn), lambda j: (0, j)),
        ),
        compiler_params=pltpu.CompilerParams(
            dimension_semantics=("parallel",),
            vmem_limit_bytes=_vmem_budget_bytes(),
        ),
    )(vec, w_mod, b2)


# --------------------------------------------------------------------------
# Kernel 2: fused LayerNorm (no affine) + adaLN modulation + final Linear
# --------------------------------------------------------------------------
def _last_layer_kernel(x_ref, mod_ref, w_ref, b_ref, o_ref, *, eps, inv_hidden):
    # x_ref:   (1, tile_seq, hidden)   -> current batch / seq tile
    # mod_ref: (1, 2, hidden)          -> [shift; 1+scale] for this batch element
    # w_ref:   (hidden, out_pad)       -> final linear weight (resident, padded)
    # b_ref:   (1, out_pad)            -> final linear bias   (resident, padded)
    # o_ref:   (1, tile_seq, out_pad)  -> lane-dense (out_pad % 128 == 0)
    x = x_ref[0].astype(jnp.float32)                 # (tile_seq, hidden)
    m = mod_ref[0].astype(jnp.float32)               # (2, hidden)
    shift = m[0:1, :]                                # (1, hidden)
    scale1 = m[1:2, :]                               # (1, hidden), already (1 + scale)

    # LayerNorm over the feature axis (f32 math, eps inside rsqrt).
    mean = jnp.sum(x, axis=-1, keepdims=True) * inv_hidden
    xc = x - mean
    var = jnp.sum(xc * xc, axis=-1, keepdims=True) * inv_hidden
    xn = xc * jax.lax.rsqrt(var + eps)               # rsqrt -> EUP slot

    # adaLN modulation, then final projection on the MXU (native weight dtype).
    y = xn * scale1 + shift                          # (tile_seq, hidden)
    out = jnp.dot(y.astype(w_ref.dtype), w_ref[...],
                  preferred_element_type=jnp.float32)
    o_ref[0] = (out + b_ref[...].astype(jnp.float32)).astype(o_ref.dtype)


def last_layer_fused(x: jax.Array, mod: jax.Array, w_lin: jax.Array,
                     b_lin: jax.Array, *, eps: float = 1e-6) -> jax.Array:
    """x: [B, S, H], mod: [B, 2, H] (shift, 1+scale), w_lin: [H, O], b_lin: [O]."""
    batch, seq, hidden = x.shape
    out_dim = w_lin.shape[1]
    itemsize = jnp.dtype(x.dtype).itemsize
    sublane = {4: 8, 2: 16, 1: 32}.get(itemsize, 8)

    # Lane-dense output: pad out_dim (16/64 << 128) up to a multiple of 128 so
    # every row store is an unmasked vst; slice the padding off afterwards.
    out_pad = _round_up(out_dim, 128)
    if out_pad != out_dim:
        w_lin = jnp.pad(w_lin, ((0, 0), (0, out_pad - out_dim)))
        b_lin = jnp.pad(b_lin, ((0, out_pad - out_dim),))
    b2 = b_lin.reshape(1, out_pad)

    vmem_limit = _vmem_budget_bytes()
    # Byte-targeted row tile: ~8 MiB x-blocks on 128 MiB-VMEM chips (v5e/v6e),
    # ~4 MiB on v7x (64 MiB physical, f32 upcast temp budgeted), rounded to the
    # dtype's sublane packing; full seq when it is small.
    target_bytes = 8 * 1024 * 1024 if vmem_limit >= (96 << 20) else 4 * 1024 * 1024
    rows = target_bytes // max(1, hidden * itemsize)
    tile_seq = max(sublane, (rows // sublane) * sublane)
    if tile_seq >= seq:
        tile_seq = seq
    if batch == 1 and seq > 2 * sublane:
        # Keep >= 2 seq grid steps so batch-1 runs don't strand a v7x TensorCore.
        half = _round_up(pl.cdiv(seq, 2), sublane)
        tile_seq = min(tile_seq, half)

    grid = (batch, pl.cdiv(seq, tile_seq))

    flops = 2 * batch * seq * hidden * out_pad + 8 * batch * seq * hidden
    bytes_accessed = (
        batch * seq * hidden * itemsize            # read x
        + batch * seq * out_pad * itemsize         # write out
        + mod.size * jnp.dtype(mod.dtype).itemsize
        + w_lin.size * jnp.dtype(w_lin.dtype).itemsize
        + b2.size * jnp.dtype(b2.dtype).itemsize)
    cost = pl.CostEstimate(flops=flops,
                           transcendentals=batch * seq,
                           bytes_accessed=bytes_accessed)

    out = pl.pallas_call(
        functools.partial(_last_layer_kernel, eps=eps, inv_hidden=1.0 / hidden),
        out_shape=jax.ShapeDtypeStruct((batch, seq, out_pad), x.dtype),
        grid_spec=pltpu.PrefetchScalarGridSpec(
            num_scalar_prefetch=0,
            grid=grid,
            in_specs=[
                pl.BlockSpec((1, tile_seq, hidden), lambda b, s: (b, s, 0)),
                pl.BlockSpec((1, 2, hidden), lambda b, s: (b, 0, 0)),
                pl.BlockSpec((hidden, out_pad), lambda b, s: (0, 0)),  # resident
                pl.BlockSpec((1, out_pad), lambda b, s: (0, 0)),       # resident
            ],
            out_specs=pl.BlockSpec((1, tile_seq, out_pad), lambda b, s: (b, s, 0)),
        ),
        compiler_params=pltpu.CompilerParams(
            dimension_semantics=("parallel", "parallel"),
            vmem_limit_bytes=vmem_limit,
        ),
        cost_estimate=cost,
    )(x, mod, w_lin, b2)

    return out[..., :out_dim] if out_pad != out_dim else out


# --------------------------------------------------------------------------
# Module mirror
# --------------------------------------------------------------------------
class LastLayer:
    """JAX/Pallas mirror of the Flux `LastLayer` module (synthetic init)."""

    def __init__(self, hidden_size: int, patch_size: int, out_channels: int,
                 dtype=jnp.float32):
        self.hidden_size = hidden_size
        self.out_dim = patch_size * patch_size * out_channels
        key = jax.random.PRNGKey(42)
        k1, k2, k3, k4 = jax.random.split(key, 4)
        s = 1.0 / (hidden_size ** 0.5)
        # Weights stored as [in, out] (already transposed vs torch's [out, in]).
        self.w_mod = (jax.random.normal(k1, (hidden_size, 2 * hidden_size)) * s).astype(dtype)
        self.b_mod = (jax.random.normal(k2, (2 * hidden_size,)) * 0.1).astype(dtype)
        self.w_lin = (jax.random.normal(k3, (hidden_size, self.out_dim)) * s).astype(dtype)
        self.b_lin = (jax.random.normal(k4, (self.out_dim,)) * 0.1).astype(dtype)
        # Fold the "+1" of (1 + scale) into the scale half of the adaLN bias
        # once, so kernel 2 skips a tile_seq x hidden VALU add per grid step.
        self._b_mod_fused = self.b_mod.at[hidden_size:].add(
            jnp.asarray(1.0, dtype=self.b_mod.dtype))

    def __call__(self, x: jax.Array, vec: jax.Array) -> jax.Array:
        batch, _, hidden = x.shape
        mod = adaln_modulation(vec, self.w_mod, self._b_mod_fused)  # [B, 2H]
        mod3 = mod.reshape(batch, 2, hidden)                        # [:,0]=shift, [:,1]=1+scale
        return last_layer_fused(x, mod3, self.w_lin, self.b_lin, eps=1e-6)


# --------------------------------------------------------------------------
# Pure-JAX reference + self-test
# --------------------------------------------------------------------------
def _reference(x, vec, w_mod, b_mod, w_lin, b_lin, eps=1e-6):
    v = vec.astype(jnp.float32)
    sv = v * jax.nn.sigmoid(v)
    mod = sv @ w_mod.astype(jnp.float32) + b_mod.astype(jnp.float32)
    h = x.shape[-1]
    shift, scale = mod[:, :h], mod[:, h:]
    xf = x.astype(jnp.float32)
    mean = jnp.mean(xf, axis=-1, keepdims=True)
    var = jnp.mean((xf - mean) ** 2, axis=-1, keepdims=True)
    xn = (xf - mean) * jax.lax.rsqrt(var + eps)
    y = (1.0 + scale[:, None, :]) * xn + shift[:, None, :]
    out = y @ w_lin.astype(jnp.float32) + b_lin.astype(jnp.float32)
    return out.astype(x.dtype)


if __name__ == "__main__":
    key = jax.random.PRNGKey(0)
    batch, seq, hidden = 2, 8, 32
    patch_size, out_channels = 2, 4

    kx, kv = jax.random.split(key)
    x = jax.random.normal(kx, (batch, seq, hidden), dtype=jnp.float32)
    vec = jax.random.normal(kv, (batch, hidden), dtype=jnp.float32)

    layer = LastLayer(hidden, patch_size, out_channels)
    out = jax.block_until_ready(layer(x, vec))

    ref = _reference(x, vec, layer.w_mod, layer.b_mod, layer.w_lin, layer.b_lin)
    assert out.shape == (batch, seq, patch_size * patch_size * out_channels)
    assert out.dtype == x.dtype
    assert jnp.allclose(out, ref, atol=2e-3, rtol=2e-3), float(jnp.max(jnp.abs(out - ref)))
    print("KERNEL_OK")
</pallas_src>

<mosaic_0001>
module attributes {stable_mosaic.version = 11 : i64} {
  func.func @_adaln_kernel(%arg0: i32, %arg1: memref<2x32xf32, #tpu.memory_space<vmem>>, %arg2: memref<32x64xf32, #tpu.memory_space<vmem>>, %arg3: memref<1x64xf32, #tpu.memory_space<vmem>>, %arg4: memref<2x64xf32, #tpu.memory_space<vmem>>) attributes {dimension_semantics = [#tpu.dimension_semantics<parallel>], iteration_bounds = array<i64: 1>, scalar_prefetch = 0 : i64, scratch_operands = 0 : i64, tpu.core_type = #tpu.core_type<tc>, window_params = [{pipeline_mode = #tpu.pipeline_mode<synchronous>, transform_indices = @transform_0, window_bounds = array<i64: 2, 32>}, {transform_indices = @transform_1, window_bounds = array<i64: 32, 64>}, {transform_indices = @transform_2, window_bounds = array<i64: 1, 64>}, {transform_indices = @transform_3, window_bounds = array<i64: 2, 64>}]} {
    %c0 = arith.constant 0 : index
    %c0_0 = arith.constant 0 : index
    %0 = vector.load %arg1[%c0, %c0_0] : memref<2x32xf32, #tpu.memory_space<vmem>>, vector<2x32xf32>
    %1 = arith.negf %0 : vector<2x32xf32>
    %2 = math.exp %1 : vector<2x32xf32>
    %cst = arith.constant 1.000000e+00 : f32
    %3 = vector.broadcast %cst : f32 to vector<2x32xf32>
    %4 = arith.addf %3, %2 : vector<2x32xf32>
    %5 = arith.divf %3, %4 : vector<2x32xf32>
    %6 = arith.mulf %0, %5 : vector<2x32xf32>
    %c0_1 = arith.constant 0 : index
    %c0_2 = arith.constant 0 : index
    %7 = vector.load %arg2[%c0_1, %c0_2] : memref<32x64xf32, #tpu.memory_space<vmem>>, vector<32x64xf32>
    %cst_3 = arith.constant dense<0.000000e+00> : vector<2x64xf32>
    %8 = tpu.matmul %6, %7, %cst_3 {dimension_numbers = #tpu.dot_dimension_numbers<[1], [0], [0], [1], [0, 0, 1, 1], [], []>} : vector<2x32xf32>, vector<32x64xf32>, vector<2x64xf32> -> vector<2x64xf32>
    %c0_4 = arith.constant 0 : index
    %c0_5 = arith.constant 0 : index
    %9 = vector.load %arg3[%c0_4, %c0_5] : memref<1x64xf32, #tpu.memory_space<vmem>>, vector<1x64xf32>
    %10 = vector.broadcast %9 : vector<1x64xf32> to vector<2x64xf32>
    %11 = arith.addf %8, %10 : vector<2x64xf32>
    %c0_6 = arith.constant 0 : index
    %c0_7 = arith.constant 0 : index
    %12 = vector.load %arg4[%c0_6, %c0_7] : memref<2x64xf32, #tpu.memory_space<vmem>>, vector<2x64xf32>
    tpu.vector_store %arg4[%c0_6, %c0_7], %11 {strides = array<i32>} : memref<2x64xf32, #tpu.memory_space<vmem>>, vector<2x64xf32>,
    return
  }
  func.func @transform_0(%arg0: i32) -> (i32, i32) {
    %c0_i32 = arith.constant 0 : i32
    %c0_i32_0 = arith.constant 0 : i32
    %c0_i32_1 = arith.constant 0 : i32
    return %c0_i32, %c0_i32_0 : i32, i32
  }
  func.func @transform_1(%arg0: i32) -> (i32, i32) {
    %c0_i32 = arith.constant 0 : i32
    %c0_i32_0 = arith.constant 0 : i32
    return %c0_i32, %arg0 : i32, i32
  }
  func.func @transform_2(%arg0: i32) -> (i32, i32) {
    %c0_i32 = arith.constant 0 : i32
    %c0_i32_0 = arith.constant 0 : i32
    return %c0_i32, %arg0 : i32, i32
  }
  func.func @transform_3(%arg0: i32) -> (i32, i32) {
    %c0_i32 = arith.constant 0 : i32
    %c0_i32_0 = arith.constant 0 : i32
    return %c0_i32, %arg0 : i32, i32
  }
}

</mosaic_0001>

<bundles_post_ra>
// kernel: tpu_custom_call.1
= control target key start
LH: loop header
LB: loop body
LE: loop exit
PB: predicated region body
PF: predicated region fallthrough
CT: control target
= control target key end

     0   :  { %8 = vsyncpa [#allocation3], 0  ;;  %s335_s0 = inlined_call_operand.hbm [shape: f32[2,32], index: 0, kind: input, shape index: {}]   ;;  %s336_s1 = inlined_call_operand.hbm [shape: f32[32,64], index: 1, kind: input, shape index: {}]   ;;  %s337_s2 = inlined_call_operand.vmem [shape: f32[1,64], index: 2, kind: input, shape index: {}]   ;;  %s338_s3 = inlined_call_operand.hbm [shape: f32[2,64], index: 3, kind: output, shape index: {}]  }
   0x1   :  { %9 = vsyncpa [#allocation6], 0 }
   0x2   :  { %10 = vsyncpa [#allocation4], 0  ;;  %s261_s12 = smov [#allocation2]   ;;  %s262_s14 = smov [#allocation5]  }
   0x3   :  { %s17_s13 = sshll.u32 %s261_s12, 4  ;;  %s26_s15 = sshll.u32 %s262_s14, 4  ;;  %s18_s13 = int_to_ptr.vmem [resolvable:$true] %s17_s13  ;;  %s289_s15 = int_to_ptr.vmem [resolvable:$true] %s26_s15 }
   0x4   :  { %s189_s18 = scalar_lea.hbm %s335_s0, 32 }
   0x5   :  { %p190_p0 = scmp.ne.s32.totalorder %s335_s0, %s189_s18  ;;  %p193_p1 = scmp.lt.u32.totalorder %s189_s18, %s335_s0 }
   0x7   :  { %p195_p2 = pnand %p193_p1, %p190_p0 }
   0x9   :  { %198 = shalt.err (!%p195_p2)
}
   0xa   :  { %s199_s23 = scalar_lea.vmem %s18_s13, 32  ;;  %p204_p4 = scmp.lt.s32.totalorder %s18_s13, %s18_s13 }
   0xb   :  { %p200_p3 = scmp.ne.s32.totalorder %s18_s13, %s199_s23  ;;  %p205_p5 = scmp.lt.s32.totalorder %s199_s23, %s199_s23 }
   0xd   :  { %p206_p6 = por %p205_p5, %p204_p4 }
   0xf   :  { %p207_p7 = pnand %p206_p6, %p200_p3 }
  0x11   :  { %210 = shalt.err (!%p207_p7)
}
  0x12   :  { %20 = dma.hbm_to_vmem [thread:$0]  %s335_s0, 32, %s18_s13, [#allocation3]  }
  0x13   :  { %s211_s28 = scalar_lea.hbm %s336_s1, 512 }
  0x14   :  { %p212_p8 = scmp.ne.s32.totalorder %s336_s1, %s211_s28  ;;  %p215_p9 = scmp.lt.u32.totalorder %s211_s28, %s336_s1 }
  0x16   :  { %p217_p10 = pnand %p215_p9, %p212_p8 }
  0x18   :  { %220 = shalt.err (!%p217_p10)
}
  0x19   :  { %s221_s6 = scalar_lea.vmem %s289_s15, 512  ;;  %p226_p12 = scmp.lt.s32.totalorder %s289_s15, %s289_s15 }
  0x1a   :  { %p222_p11 = scmp.ne.s32.totalorder %s289_s15, %s221_s6  ;;  %p227_p13 = scmp.lt.s32.totalorder %s221_s6, %s221_s6 }
  0x1c   :  { %p228_p0 = por %p227_p13, %p226_p12 }
  0x1e   :  { %p229_p1 = pnand %p228_p0, %p222_p11 }
  0x20   :  { %232 = shalt.err (!%p229_p1)
}
  0x21   :  { %s263_s0 = smov 128   ;;  %s264_s7 = smov 8  }
  0x22   :  { %32 = dma.hbm_to_vmem [thread:$0]  %s336_s1, 512, %s289_s15, [#allocation6], %s263_s0, %s263_s0, %s264_s7  }
  0x23   :  { %255 = dma.done.wait [#allocation3], 32  }
  0x24   :  { %256 = vsyncadd [#allocation3], 4294967264 }
  0x25   :  { %257 = dma.done.wait [#allocation6], 512  }
  0x26   :  { %258 = vsyncadd [#allocation6], 4294966784  ;;  %v265_v0 = vmov 0.0|0.0   ;;  %vm266_vm0 = vmmov 0   ;;  %v267_v1 = vmov 0.0   ;;  %v49_v2 = vld [vmem:[#allocation5] sm:$0xff] }
  0x27   :  { %171 = vmatprep.subr.bf16.mxu0 %v265_v0  ;;  %168 = vmatprep.mubr.msk.f32.mxu0 %vm266_vm0, %v267_v1  ;;  %v50_v3 = vld [vmem:[#allocation5 + $0x8] sm:$0xff]  ;;  %v51_v4 = vld [vmem:[#allocation5 + $0x10] sm:$0xff]  ;;  %v52_v6 = vld [vmem:[#allocation5 + $0x18] sm:$0xff]  ;;  %vm60_vm1 = vcmask 261120   ;;  %s268_s11 = smov [#allocation7]   ;;  %vm134_vm2 = vcmask 517120  }
  0x28   :  { %v172_v5 = vpack.c.bf16 %v50_v3, %v49_v2  ;;  %v41_v7 = vld [vmem:[#allocation2] sm:$0x3]  ;;  %v175_v9 = vpack.c.bf16 %v52_v6, %v51_v4  ;;  %s142_s12 = sshll.u32 %s268_s11, 4  ;;  %s143_s12 = int_to_ptr.vmem [resolvable:$true] %s142_s12 }
  0x29   :  { %v152_v8 = vmul.f32 -1.442695, %v41_v7  ;;  %v153_v14 = vld [vmem:[%s337_s2] ss:$0 sm:$0xff]  ;;  %s233_s13 = scalar_lea.vmem %s143_s12, 32  ;;  %p238_p3 = scmp.lt.s32.totalorder %s143_s12, %s143_s12 }
  0x2a   :  { %173 = vmatpush3.bf16.msra.mxu0 %v172_v5  ;;  %p234_p2 = scmp.ne.s32.totalorder %s143_s12, %s233_s13  ;;  %p239_p4 = scmp.lt.s32.totalorder %s233_s13, %s233_s13 }
  0x2b   :  { %174 = vmatprep.subr.bf16.mxu0 %v265_v0  ;;  %185 = vpow2.f32 %v152_v8 }
  0x2c   :  { %p240_p5 = por %p239_p4, %p238_p3 }
  0x2e   :  { %176 = vmatpush3.bf16.msra.mxu0 %v175_v9  ;;  %p241_p6 = pnand %p240_p5, %p234_p2 }
  0x35   :  { %v186_v10 = vpop.eup %185 }
  0x36   :  { %v45_v11 = vadd.f32 1.0, %v186_v10 }
  0x38   :  { %187 = vrcp.f32 %v45_v11 }
  0x42   :  { %v188_v12 = vpop.eup %187 }
  0x43   :  { %v48_v13 = vmul.f32 %v188_v12, %v41_v7 }
  0x45   :  { %169 = vmatmul.mubr.msk.f32.vlgmr.msra.gmra.mrb[0].mxu0 %vm60_vm1, %v48_v13 }
 0x118   :  { %v130_v15 = vpop.f32.mrb[0].mxu0 }
 0x119   :  { %v131_v16 = vadd.f32 %v153_v14, %v130_v15  ;;  %v170_v17 = vpop.f32.mrb[1].mxu0 }
 0x11b   :  { %135 = vst.msk [vmem:[#allocation7] sm:$0x3] %vm134_vm2, %v131_v16 }
 0x11c   :  { %244 = shalt.err (!%p241_p6)
}
 0x11d   :  { %s245_s16 = scalar_lea.hbm %s338_s3, 32 }
 0x11e   :  { %p246_p7 = scmp.ne.s32.totalorder %s338_s3, %s245_s16  ;;  %p249_p8 = scmp.lt.u32.totalorder %s245_s16, %s338_s3 }
 0x120   :  { %p251_p9 = pnand %p249_p8, %p246_p7 }
 0x122   :  { %254 = shalt.err (!%p251_p9)
}
 0x123   :  { %145 = dma.vmem_to_hbm [thread:$0]  %s143_s12, 32, %s338_s3, [#allocation4]  }
 0x124   :  { %259 = dma.done.wait [#allocation4], 32  }
 0x125   :  { %260 = vsyncadd [#allocation4], 4294967264 }
 0x126   :  { %149 = vsyncpa [#allocation3], 1 }
 0x127   :  { %150 = vsyncpa [#allocation6], 1 }
 0x128   :  { %151 = vsyncpa [#allocation4], 1 }

</bundles_post_ra>
